<compile_context>
chip_gen: v7x
topology: tpu7x:2x2x1
jax: 0.10.0
libtpu: 0.0.40
codegen_flags: <defaults>
</compile_context>

<pallas_src>
import functools
import math

import jax
import jax.numpy as jnp
from jax.experimental import pallas as pl
from jax.experimental.pallas import tpu as pltpu


def _conv_stats_kernel(p_ref, w_ref, b_ref, y_ref, st_ref):
    """Pass 1: 3x3 conv as a single MXU matmul over host-side im2col patches + bias,
    plus per-channel sum / sum-of-squares accumulated across spatial tiles.

    Kernel views:
      p_ref  : (1, 9*C_in, TN)   im2col patch tile (spatial on the lane axis)
      w_ref  : (C_out, 9*C_in)   flattened conv weight (resident, constant index_map)
      b_ref  : (C_out, 1)        conv bias (resident)
      y_ref  : (1, C_out, TN)    conv output tile (lane-dense full-width stores)
      st_ref : (1, 2, C_out, 1)  [sum, sumsq] per channel, resident across the tile axis
    """
    t = pl.program_id(1)

    @pl.when(t == 0)
    def _init():
        st_ref[...] = jnp.zeros_like(st_ref)

    # One wide MXU matmul (f32 accumulation) + bias broadcast over lanes.
    y = jnp.dot(w_ref[...], p_ref[0], preferred_element_type=jnp.float32)  # (C_out, TN)
    y = y + b_ref[...]
    y_ref[0] = y

    # One-pass GroupNorm statistics: per-channel sum and sum of squares (XLU reductions).
    st_ref[0, 0, :, :] += jnp.sum(y, axis=-1, keepdims=True)
    st_ref[0, 1, :, :] += jnp.sum(y * y, axis=-1, keepdims=True)


def _norm_act_kernel(y_ref, ab_ref, o_ref):
    """Pass 2: out = silu(a * y + b) where a, b fold GroupNorm rsqrt/affine + FiLM.

    Kernel views:
      y_ref  : (1, C_out, TN)    conv output tile
      ab_ref : (1, 2, C_out, 1)  a = ab[0,0], b = ab[0,1]; resident per batch element
      o_ref  : (1, C_out, TN)    output tile
    """
    z = y_ref[0] * ab_ref[0, 0, :, :] + ab_ref[0, 1, :, :]
    sig = pl.reciprocal(1.0 + jnp.exp(-z))      # exp + recip -> EUP, no VALU divide
    o_ref[0] = z * sig


def _pick_spatial_tile(n, max_tile):
    """Largest tile that divides N and is a multiple of 128, capped at max_tile.
    Falls back to the full extent when N is small or has no such divisor."""
    if n <= max_tile:
        return n
    t = (max_tile // 128) * 128
    while t >= 128:
        if n % t == 0:
            return t
        t -= 128
    return n


def block_forward(x, w_conv, b_conv, gamma, beta, scale_shift=None,
                  *, groups=8, eps=1e-5, max_tile=1024):
    """x: (B, C_in, H, W) f32 -> (B, C_out, H, W) f32 (matches PyTorch Block.forward)."""
    B, C_in, H, W = x.shape
    C_out = w_conv.shape[0]
    assert C_out % groups == 0
    cg = C_out // groups
    N = H * W
    K9 = 9 * C_in

    x = x.astype(jnp.float32)

    # --- host-side im2col (layout plumbing only; kernel sees a lane-dense slab) ------
    # patches[b, (ky*3 + kx)*C_in + ci, h*W + w] = x_pad[b, ci, h+ky, w+kx]
    x_pad = jnp.pad(x, ((0, 0), (0, 0), (1, 1), (1, 1)))
    cols = [x_pad[:, :, ky:ky + H, kx:kx + W] for ky in range(3) for kx in range(3)]
    patches = jnp.concatenate(cols, axis=1).reshape(B, K9, N)

    # Conv weight flattened to match the (ky, kx, ci) patch row order.
    w2d = jnp.transpose(w_conv, (0, 2, 3, 1)).reshape(C_out, K9).astype(jnp.float32)
    b2d = b_conv.reshape(C_out, 1).astype(jnp.float32)

    TN = _pick_spatial_tile(N, max_tile)
    T = N // TN
    vmem_limit = 64 * 1024 * 1024   # leaves headroom on v7x's 64 MiB physical VMEM

    # --- pass 1: conv (one MXU matmul per tile) + per-channel sum / sumsq ------------
    y, stats = pl.pallas_call(
        _conv_stats_kernel,
        out_shape=(jax.ShapeDtypeStruct((B, C_out, N), jnp.float32),
                   jax.ShapeDtypeStruct((B, 2, C_out, 1), jnp.float32)),
        grid_spec=pltpu.PrefetchScalarGridSpec(
            num_scalar_prefetch=0,
            grid=(B, T),
            in_specs=[
                pl.BlockSpec((1, K9, TN), lambda b, t: (b, 0, t)),       # patches
                pl.BlockSpec((C_out, K9), lambda b, t: (0, 0)),          # weight (resident)
                pl.BlockSpec((C_out, 1), lambda b, t: (0, 0)),           # bias (resident)
            ],
            out_specs=(
                pl.BlockSpec((1, C_out, TN), lambda b, t: (b, 0, t)),        # y
                pl.BlockSpec((1, 2, C_out, 1), lambda b, t: (b, 0, 0, 0)),   # stats (acc)
            ),
        ),
        compiler_params=pltpu.CompilerParams(
            dimension_semantics=("parallel", "arbitrary"),
            vmem_limit_bytes=vmem_limit),
    )(patches, w2d, b2d)

    # --- tiny host-side fold: group stats -> per-(batch, channel) affine a, b --------
    s = stats[:, 0, :, 0]                                    # (B, C_out)
    ss = stats[:, 1, :, 0]
    cnt = float(cg * N)
    mu_g = s.reshape(B, groups, cg).sum(axis=2) / cnt        # (B, groups)
    ex2_g = ss.reshape(B, groups, cg).sum(axis=2) / cnt
    var_g = ex2_g - mu_g * mu_g                              # one-pass variance
    rstd_g = jax.lax.rsqrt(var_g + eps)
    mu_c = jnp.repeat(mu_g, cg, axis=1)                      # (B, C_out)
    rstd_c = jnp.repeat(rstd_g, cg, axis=1)
    g = gamma.astype(jnp.float32)[None, :] * rstd_c
    a_c = g
    b_c = beta.astype(jnp.float32)[None, :] - g * mu_c
    if scale_shift is not None:                              # FiLM folded at trace time
        scale, shift = scale_shift
        sc = scale.reshape(B, C_out).astype(jnp.float32)
        sh = shift.reshape(B, C_out).astype(jnp.float32)
        a_c = a_c * (sc + 1.0)
        b_c = b_c * (sc + 1.0) + sh
    ab = jnp.stack([a_c, b_c], axis=1).reshape(B, 2, C_out, 1)

    # --- pass 2: out = silu(a*y + b) on lane-dense tiles ------------------------------
    out = pl.pallas_call(
        _norm_act_kernel,
        out_shape=jax.ShapeDtypeStruct((B, C_out, N), jnp.float32),
        grid_spec=pltpu.PrefetchScalarGridSpec(
            num_scalar_prefetch=0,
            grid=(B, T),
            in_specs=[
                pl.BlockSpec((1, C_out, TN), lambda b, t: (b, 0, t)),
                pl.BlockSpec((1, 2, C_out, 1), lambda b, t: (b, 0, 0, 0)),
            ],
            out_specs=pl.BlockSpec((1, C_out, TN), lambda b, t: (b, 0, t)),
        ),
        compiler_params=pltpu.CompilerParams(
            dimension_semantics=("parallel", "parallel"),
            vmem_limit_bytes=vmem_limit),
    )(y, ab)

    # (B, C_out, N) -> (B, C_out, H, W): contiguous reshape, no transpose.
    return out.reshape(B, C_out, H, W)


def block_reference(x, w_conv, b_conv, gamma, beta, scale_shift=None,
                    *, groups=8, eps=1e-5):
    """Pure-JAX reference mirroring the PyTorch Block module."""
    B, C_in, H, W = x.shape
    C_out = w_conv.shape[0]
    y = jax.lax.conv_general_dilated(
        x, w_conv, window_strides=(1, 1), padding=((1, 1), (1, 1)),
        dimension_numbers=("NCHW", "OIHW", "NCHW"))
    y = y + b_conv[None, :, None, None]
    cg = C_out // groups
    yg = y.reshape(B, groups, cg, H, W)
    mu = jnp.mean(yg, axis=(2, 3, 4), keepdims=True)
    var = jnp.mean((yg - mu) ** 2, axis=(2, 3, 4), keepdims=True)
    yn = (yg - mu) / jnp.sqrt(var + eps)
    yn = yn.reshape(B, C_out, H, W)
    yn = yn * gamma[None, :, None, None] + beta[None, :, None, None]
    if scale_shift is not None:
        scale, shift = scale_shift
        yn = yn * (scale + 1.0) + shift
    return yn * jax.nn.sigmoid(yn)


if __name__ == "__main__":
    B, C_in, H, W = 2, 4, 16, 16
    C_out, groups = 32, 8

    key = jax.random.PRNGKey(0)
    k0, k1, k2, k3, k4, k5, k6 = jax.random.split(key, 7)

    x = jax.random.normal(k0, (B, C_in, H, W), dtype=jnp.float32)

    bound = 1.0 / math.sqrt(C_in * 9)   # PyTorch conv fan-in uniform bound
    w_conv = jax.random.uniform(k1, (C_out, C_in, 3, 3), jnp.float32, -bound, bound)
    b_conv = jax.random.uniform(k2, (C_out,), jnp.float32, -bound, bound)
    gamma = 1.0 + 0.1 * jax.random.normal(k3, (C_out,), dtype=jnp.float32)
    beta = 0.1 * jax.random.normal(k4, (C_out,), dtype=jnp.float32)
    scale = 0.1 * jax.random.normal(k5, (B, C_out, 1, 1), dtype=jnp.float32)
    shift = 0.1 * jax.random.normal(k6, (B, C_out, 1, 1), dtype=jnp.float32)

    # 1) FiLM path (time-embedding scale/shift), single spatial tile (N <= max_tile).
    out = block_forward(x, w_conv, b_conv, gamma, beta, (scale, shift), groups=groups)
    out = jax.block_until_ready(out)
    ref = block_reference(x, w_conv, b_conv, gamma, beta, (scale, shift), groups=groups)
    ref = jax.block_until_ready(ref)
    assert out.shape == (B, C_out, H, W)
    assert jnp.allclose(out, ref, atol=2e-4, rtol=2e-4), (
        float(jnp.max(jnp.abs(out - ref))))

    # 2) No-FiLM path (scale_shift=None), specialized at trace time.
    out2 = block_forward(x, w_conv, b_conv, gamma, beta, None, groups=groups)
    out2 = jax.block_until_ready(out2)
    ref2 = block_reference(x, w_conv, b_conv, gamma, beta, None, groups=groups)
    assert jnp.allclose(out2, ref2, atol=2e-4, rtol=2e-4), (
        float(jnp.max(jnp.abs(out2 - ref2))))

    # 3) Force the multi-tile path (max_tile=128 -> 2 spatial tiles) to exercise the
    #    cross-tile stats accumulator (pl.when init + "arbitrary" tile axis).
    out3 = block_forward(x, w_conv, b_conv, gamma, beta, (scale, shift),
                         groups=groups, max_tile=128)
    out3 = jax.block_until_ready(out3)
    assert jnp.allclose(out3, ref, atol=2e-4, rtol=2e-4), (
        float(jnp.max(jnp.abs(out3 - ref))))

    print("KERNEL_OK")
</pallas_src>

<mosaic_0001>
module attributes {stable_mosaic.version = 11 : i64} {
  func.func @_conv_stats_kernel(%arg0: i32, %arg1: i32, %arg2: memref<1x36x256xf32, #tpu.memory_space<vmem>>, %arg3: memref<32x36xf32, #tpu.memory_space<vmem>>, %arg4: memref<32x1xf32, #tpu.memory_space<vmem>>, %arg5: memref<1x32x256xf32, #tpu.memory_space<vmem>>, %arg6: memref<1x2x32x1xf32, #tpu.memory_space<vmem>>) attributes {dimension_semantics = [#tpu.dimension_semantics<parallel>, #tpu.dimension_semantics<arbitrary>], iteration_bounds = array<i64: 2, 1>, scalar_prefetch = 0 : i64, scratch_operands = 0 : i64, tpu.core_type = #tpu.core_type<tc>, window_params = [{transform_indices = @transform_0, window_bounds = array<i64: 1, 36, 256>}, {pipeline_mode = #tpu.pipeline_mode<synchronous>, transform_indices = @transform_1, window_bounds = array<i64: 32, 36>}, {pipeline_mode = #tpu.pipeline_mode<synchronous>, transform_indices = @transform_2, window_bounds = array<i64: 32, 1>}, {transform_indices = @transform_3, window_bounds = array<i64: 1, 32, 256>}, {transform_indices = @transform_4, window_bounds = array<i64: 1, 2, 32, 1>}]} {
    %c0_i32 = arith.constant 0 : i32
    %0 = arith.cmpi eq, %arg1, %c0_i32 : i32
    %1 = arith.extui %0 : i1 to i32
    %c0_i32_0 = arith.constant 0 : i32
    %2 = arith.cmpi ne, %1, %c0_i32_0 : i32
    scf.if %2 {
      %cst_27 = arith.constant 0.000000e+00 : f32
      %30 = vector.broadcast %cst_27 : f32 to vector<1x2x32x1xf32>
      %c0_28 = arith.constant 0 : index
      %c0_29 = arith.constant 0 : index
      %c0_30 = arith.constant 0 : index
      %c0_31 = arith.constant 0 : index
      %31 = vector.load %arg6[%c0_28, %c0_29, %c0_30, %c0_31] : memref<1x2x32x1xf32, #tpu.memory_space<vmem>>, vector<1x2x32x1xf32>
      tpu.vector_store %arg6[%c0_28, %c0_29, %c0_30, %c0_31], %30 {strides = array<i32>} : memref<1x2x32x1xf32, #tpu.memory_space<vmem>>, vector<1x2x32x1xf32>,
    } else {
    }
    %c0 = arith.constant 0 : index
    %c0_1 = arith.constant 0 : index
    %3 = vector.load %arg3[%c0, %c0_1] : memref<32x36xf32, #tpu.memory_space<vmem>>, vector<32x36xf32>
    %c0_2 = arith.constant 0 : index
    %c0_3 = arith.constant 0 : index
    %c0_4 = arith.constant 0 : index
    %4 = vector.load %arg2[%c0_2, %c0_3, %c0_4] : memref<1x36x256xf32, #tpu.memory_space<vmem>>, vector<1x36x256xf32>
    %5 = vector.shape_cast %4 : vector<1x36x256xf32> to vector<36x256xf32>
    %cst = arith.constant dense<0.000000e+00> : vector<32x256xf32>
    %6 = tpu.matmul %3, %5, %cst {dimension_numbers = #tpu.dot_dimension_numbers<[1], [0], [0], [1], [0, 0, 1, 1], [], []>} : vector<32x36xf32>, vector<36x256xf32>, vector<32x256xf32> -> vector<32x256xf32>
    %c0_5 = arith.constant 0 : index
    %c0_6 = arith.constant 0 : index
    %7 = vector.load %arg4[%c0_5, %c0_6] : memref<32x1xf32, #tpu.memory_space<vmem>>, vector<32x1xf32>
    %8 = vector.broadcast %7 : vector<32x1xf32> to vector<32x256xf32>
    %9 = arith.addf %6, %8 : vector<32x256xf32>
    %c0_7 = arith.constant 0 : index
    %c0_8 = arith.constant 0 : index
    %c0_9 = arith.constant 0 : index
    %10 = vector.load %arg5[%c0_7, %c0_8, %c0_9] : memref<1x32x256xf32, #tpu.memory_space<vmem>>, vector<1x32x256xf32>
    %11 = vector.shape_cast %10 : vector<1x32x256xf32> to vector<32x256xf32>
    %12 = vector.shape_cast %9 : vector<32x256xf32> to vector<1x32x256xf32>
    tpu.vector_store %arg5[%c0_7, %c0_8, %c0_9], %12 {strides = array<i32>} : memref<1x32x256xf32, #tpu.memory_space<vmem>>, vector<1x32x256xf32>,
    %c0_10 = arith.constant 0 : index
    %c0_11 = arith.constant 0 : index
    %c0_12 = arith.constant 0 : index
    %c0_13 = arith.constant 0 : index
    %13 = vector.load %arg6[%c0_10, %c0_11, %c0_12, %c0_13] : memref<1x2x32x1xf32, #tpu.memory_space<vmem>>, vector<1x1x32x1xf32>
    %14 = vector.shape_cast %13 : vector<1x1x32x1xf32> to vector<32x1xf32>
    %cst_14 = arith.constant dense<0.000000e+00> : vector<32xf32>
    %15 = vector.multi_reduction <add>, %9, %cst_14 [1] : vector<32x256xf32> to vector<32xf32>
    %16 = vector.shape_cast %15 : vector<32xf32> to vector<32x1xf32>
    %17 = arith.addf %14, %16 : vector<32x1xf32>
    %c0_15 = arith.constant 0 : index
    %c0_16 = arith.constant 0 : index
    %c0_17 = arith.constant 0 : index
    %c0_18 = arith.constant 0 : index
    %18 = vector.load %arg6[%c0_15, %c0_16, %c0_17, %c0_18] : memref<1x2x32x1xf32, #tpu.memory_space<vmem>>, vector<1x1x32x1xf32>
    %19 = vector.shape_cast %18 : vector<1x1x32x1xf32> to vector<32x1xf32>
    %20 = vector.shape_cast %17 : vector<32x1xf32> to vector<1x1x32x1xf32>
    tpu.vector_store %arg6[%c0_15, %c0_16, %c0_17, %c0_18], %20 {strides = array<i32>} : memref<1x2x32x1xf32, #tpu.memory_space<vmem>>, vector<1x1x32x1xf32>,
    %c0_19 = arith.constant 0 : index
    %c1 = arith.constant 1 : index
    %c0_20 = arith.constant 0 : index
    %c0_21 = arith.constant 0 : index
    %21 = vector.load %arg6[%c0_19, %c1, %c0_20, %c0_21] : memref<1x2x32x1xf32, #tpu.memory_space<vmem>>, vector<1x1x32x1xf32>
    %22 = vector.shape_cast %21 : vector<1x1x32x1xf32> to vector<32x1xf32>
    %23 = arith.mulf %9, %9 : vector<32x256xf32>
    %cst_22 = arith.constant dense<0.000000e+00> : vector<32xf32>
    %24 = vector.multi_reduction <add>, %23, %cst_22 [1] : vector<32x256xf32> to vector<32xf32>
    %25 = vector.shape_cast %24 : vector<32xf32> to vector<32x1xf32>
    %26 = arith.addf %22, %25 : vector<32x1xf32>
    %c0_23 = arith.constant 0 : index
    %c1_24 = arith.constant 1 : index
    %c0_25 = arith.constant 0 : index
    %c0_26 = arith.constant 0 : index
    %27 = vector.load %arg6[%c0_23, %c1_24, %c0_25, %c0_26] : memref<1x2x32x1xf32, #tpu.memory_space<vmem>>, vector<1x1x32x1xf32>
    %28 = vector.shape_cast %27 : vector<1x1x32x1xf32> to vector<32x1xf32>
    %29 = vector.shape_cast %26 : vector<32x1xf32> to vector<1x1x32x1xf32>
    tpu.vector_store %arg6[%c0_23, %c1_24, %c0_25, %c0_26], %29 {strides = array<i32>} : memref<1x2x32x1xf32, #tpu.memory_space<vmem>>, vector<1x1x32x1xf32>,
    return
  }
  func.func @transform_0(%arg0: i32, %arg1: i32) -> (i32, i32, i32) {
    %c0_i32 = arith.constant 0 : i32
    %c0_i32_0 = arith.constant 0 : i32
    return %arg0, %c0_i32, %arg1 : i32, i32, i32
  }
  func.func @transform_1(%arg0: i32, %arg1: i32) -> (i32, i32) {
    %c0_i32 = arith.constant 0 : i32
    %c0_i32_0 = arith.constant 0 : i32
    %c0_i32_1 = arith.constant 0 : i32
    return %c0_i32, %c0_i32_0 : i32, i32
  }
  func.func @transform_2(%arg0: i32, %arg1: i32) -> (i32, i32) {
    %c0_i32 = arith.constant 0 : i32
    %c0_i32_0 = arith.constant 0 : i32
    %c0_i32_1 = arith.constant 0 : i32
    return %c0_i32, %c0_i32_0 : i32, i32
  }
  func.func @transform_3(%arg0: i32, %arg1: i32) -> (i32, i32, i32) {
    %c0_i32 = arith.constant 0 : i32
    %c0_i32_0 = arith.constant 0 : i32
    return %arg0, %c0_i32, %arg1 : i32, i32, i32
  }
  func.func @transform_4(%arg0: i32, %arg1: i32) -> (i32, i32, i32, i32) {
    %c0_i32 = arith.constant 0 : i32
    %c0_i32_0 = arith.constant 0 : i32
    %c0_i32_1 = arith.constant 0 : i32
    %c0_i32_2 = arith.constant 0 : i32
    return %arg0, %c0_i32, %c0_i32_0, %c0_i32_1 : i32, i32, i32, i32
  }
}

</mosaic_0001>

<bundles_post_ra>
// kernel: tpu_custom_call.1
= control target key start
LH: loop header
LB: loop body
LE: loop exit
PB: predicated region body
PF: predicated region fallthrough
CT: control target
= control target key end

     0   :  { %10 = vsyncpa [#allocation3], 0  ;;  %s1435_s0 = inlined_call_operand.hbm [shape: f32[2,36,256], index: 0, kind: input, shape index: {}]   ;;  %s1436_s1 = inlined_call_operand.hbm [shape: f32[32,36], index: 1, kind: input, shape index: {}]   ;;  %s1437_s2 = inlined_call_operand.hbm [shape: f32[32,1], index: 2, kind: input, shape index: {}]   ;;  %s1438_s3 = inlined_call_operand.hbm [shape: f32[2,32,256], index: 3, kind: output, shape index: {0}]   ;;  %s1439_s4 = inlined_call_operand.hbm [shape: f32[2,2,32,1], index: 4, kind: output, shape index: {1}]  }
   0x1   :  { %12 = vsyncpa [#allocation3 + $0x1], 0 }
   0x2   :  { %13 = vsyncpa [#allocation6], 0 }
   0x3   :  { %14 = vsyncpa [#allocation4], 0 }
   0x4   :  { %16 = vsyncpa [#allocation4 + $0x1], 0 }
   0x5   :  { %17 = vsyncpa [#allocation10], 0 }
   0x6   :  { %19 = vsyncpa [#allocation10 + $0x1], 0  ;;  %s1076_s15 = smov 0   ;;  %s1078_s16 = smov 0  }
   0x7   :  { %s1080_s17 = smov 0   ;;  %s1082_s18 = smov 0  }
   0x8   :  { %s1084_s19 = smov 0   ;;  %s1086_s20 = smov 0  }
   0x9 LB: > { %s677_s21 = sadd.s32 4294967295, %s1034_s20   ;;  %s678_s22 = sadd.s32 4294967294, %s1034_s20   ;;  %s1034_s20 = sphi %s1086_s20, %s25_s20   ;;  %s1030_s19 = sphi %s1084_s19, %s1461_s19   ;;  %s1026_s18 = sphi %s1082_s18, %s1460_s18   ;;  %s1022_s17 = sphi %s1080_s17, %s1459_s17   ;;  %s1018_s16 = sphi %s1078_s16, %s1458_s16   ;;  %s1014_s15 = sphi %s1076_s15, %s1457_s15  }
   0xa   : > { %p59_p0 = scmp.ne.s32.totalorder %s1018_s16, %s1014_s15  ;;  %p1110_p1 = scmp.eq.s32.totalorder %s677_s21, 0 }
   0xb   : > { %p1114_p2 = scmp.eq.s32.totalorder %s677_s21, 1  ;;  %p133_p3 = scmp.eq.s32.totalorder %s678_s22, 1 }
   0xc   : > { %s1444_s23 = scalar_select %p1110_p1, 1, 0 }
   0xd   : > { %p1120_p4 = por %p1110_p1, %p59_p0  ;;  %p679_p5 = scmp.ge.s32.totalorder %s1034_s20, 1 }
   0xe   : > { %p1125_p6 = por %p133_p3, %p59_p0  ;;  %p166_p7 = scmp.lt.s32.totalorder %s1034_s20, 3 }
   0xf   : > { %s1446_s25 = scalar_select %p1120_p4, 1, 0 }
  0x10   : > { %s1447_s26 = scalar_select %p1125_p6, 1, 0 }
  0x11   : > { %p1130_p8 = pnand %p679_p5, %p166_p7  ;;  %s1036_s28 = smov [#allocation5]  }
  0x12   : > { %s178_s29 = sshll.u32 %s1036_s28, 4  ;;  %s1037_s5 = smov [#allocation7]   ;;  %s1134_s29 = int_to_ptr.vmem [resolvable:$true] %s178_s29 }
  0x13   : > { %p744_p9 = pneg %p1130_p8  ;;  %s191_s6 = sshll.u32 %s1037_s5, 4  ;;  %s1145_s6 = int_to_ptr.vmem [resolvable:$true] %s191_s6 }
  0x14   : > { %s830_s9 = scalar_lea.hbm %s1436_s1, 512 }
  0x15   : > { %p1141_p11 = pnand %p744_p9, %p1110_p1  ;;  %p831_p12 = scmp.ne.s32.totalorder %s1436_s1, %s830_s9 }
  0x16   : > { %p837_p5 = scmp.lt.u32.totalorder %s830_s9, %s1436_s1 }
  0x17   : > { %p832_p13 = pneg %p1141_p11 }
  0x19   : > { %p833_p0 = pnand %p832_p13, %p831_p12 }
  0x1b   : > { %p834_p3 = pneg %p833_p0 }
  0x1d   : > { %p839_p7 = pnand %p837_p5, %p834_p3 }
  0x1f   : > { %842 = shalt.err (!%p839_p7)
}
  0x20   : > { %s843_s14 = scalar_lea.vmem %s1134_s29, 512  ;;  %p851_p1 = scmp.lt.s32.totalorder %s1134_s29, %s1134_s29 }
  0x21   : > { %p844_p9 = scmp.ne.s32.totalorder %s1134_s29, %s843_s14  ;;  %p852_p12 = scmp.lt.s32.totalorder %s843_s14, %s843_s14 }
  0x23   : > { %p846_p10 = pnand %p844_p9, %p832_p13  ;;  %p853_p0 = por %p852_p12, %p851_p1 }
  0x25   : > { %p847_p6 = pneg %p846_p10 }
  0x27   : > { %p854_p4 = pnand %p853_p0, %p847_p6 }
  0x29   : > { %857 = shalt.err (!%p854_p4)
}
  0x2a   : > { %s1038_s21 = smov 128   ;;  %s1039_s22 = smov 8  }
  0x2b   : > { %747 = dma.hbm_to_vmem [thread:$0]  (!%p1141_p11), %s1436_s1, 512, %s1134_s29, [#allocation6], %s1038_s21, %s1038_s21, %s1039_s22  }
  0x2c   : > { %s858_s9 = scalar_lea.hbm %s1437_s2, 512 }
  0x2d   : > { %p859_p1 = scmp.ne.s32.totalorder %s1437_s2, %s858_s9  ;;  %p865_p10 = scmp.lt.u32.totalorder %s858_s9, %s1437_s2 }
  0x2f   : > { %p861_p4 = pnand %p859_p1, %p832_p13 }
  0x31   : > { %p862_p6 = pneg %p861_p4 }
  0x33   : > { %p867_p3 = pnand %p865_p10, %p862_p6 }
  0x35   : > { %870 = shalt.err (!%p867_p3)
}
  0x36   : > { %s871_s29 = scalar_lea.vmem %s1145_s6, 512  ;;  %p879_p12 = scmp.lt.s32.totalorder %s1145_s6, %s1145_s6 }
  0x37   : > { %p872_p5 = scmp.ne.s32.totalorder %s1145_s6, %s871_s29  ;;  %p880_p0 = scmp.lt.s32.totalorder %s871_s29, %s871_s29 }
  0x39   : > { %p874_p7 = pnand %p872_p5, %p832_p13  ;;  %p881_p1 = por %p880_p0, %p879_p12 }
  0x3b   : > { %p875_p9 = pneg %p874_p7 }
  0x3d   : > { %p882_p4 = pnand %p881_p1, %p875_p9 }
  0x3f   : > { %885 = shalt.err (!%p882_p4)
}
  0x40   : > { %750 = dma.hbm_to_vmem [thread:$0]  (!%p1141_p11), %s1437_s2, 512, %s1145_s6, [#allocation6], %s1038_s21, %s1038_s21, %s1039_s22  }
  0x41   : > { %s37_s5 = sadd.s32 1, %s1030_s19  ;;  %s46_s7 = sadd.s32 1, %s1022_s17 }
  0x42   : > { %p39_p13 = scmp.ge.s32.totalorder %s37_s5, 2  ;;  %p53_p6 = scmp.ne.s32.totalorder %s1022_s17, %s1018_s16 }
  0x43   : > { %p54_p10 = scmp.eq.s32.totalorder %s1034_s20, 0  ;;  %p764_p3 = scmp.lt.s32.totalorder %s1034_s20, 2 }
  0x44   : > { %s1463_s5 = smov (%p39_p13, %s37_s5), 0  ;;  %p1209_p7 = por %p1114_p2, %p53_p6 }
  0x45   : > { %p55_p5 = por %p54_p10, %p53_p6  ;;  %s41_s8 = ssub.s32 %s1030_s19, %s1463_s5 }
  0x46   : > { %s1450_s30 = scalar_select %p1209_p7, 1, 0 }
  0x47   : > { %s205_s9 = sand.u32 1, %s1022_s17   ;;  %p44_p9 = scmp.eq.s32.totalorder %s41_s8, 0 }
  0x48   : > { %s727_s6 = smul.u32 80, %s205_s9  ;;  %p1216_p11 = pnand %p764_p3, %p55_p5 }
  0x49   : > { %s1221_s22 = scalar_select %p44_p9, %s1022_s17, %s46_s7  }
  0x4a   : > { %s728_s10 = smul.u32 1280, %s1030_s19  ;;  %s209_s11 = scalar_lea.vmem [#allocation2], %s727_s6 }
  0x4b   : > { %s218_s12 = sshll.u32 %s209_s11, 4  ;;  %s1231_s14 = scalar_lea.sflag [#allocation3], %s205_s9  ;;  %s1229_s12 = int_to_ptr.vmem [resolvable:$true] %s218_s12 }
  0x4c   : > { %s1227_s29 = scalar_lea.hbm %s1435_s0, %s728_s10  ;;  %p888_p12 = pneg %p1216_p11 }
  0x4d   : > { %s886_s28 = scalar_lea.hbm %s1227_s29, 1280  ;;  %s891_s6 = scalar_lea.hbm %s1435_s0, 2560 }
  0x4e   : > { %p887_p2 = scmp.ne.s32.totalorder %s1227_s29, %s886_s28  ;;  %p892_p4 = scmp.lt.u32.totalorder %s1227_s29, %s1435_s0 }
  0x4f   : > { %p893_p13 = scmp.lt.u32.totalorder %s891_s6, %s886_s28  ;;  %p895_p10 = scmp.lt.u32.totalorder %s886_s28, %s1227_s29 }
  0x50   : > { %p889_p0 = pnand %p888_p12, %p887_p2 }
  0x51   : > { %p894_p6 = por %p893_p13, %p892_p4 }
  0x52   : > { %p890_p1 = pneg %p889_p0 }
  0x53   : > { %p896_p3 = por %p895_p10, %p894_p6 }
  0x55   : > { %p897_p5 = pnand %p896_p3, %p890_p1 }
  0x57   : > { %900 = shalt.err (!%p897_p5)
}
  0x58   : > { %s901_s9 = scalar_lea.vmem %s1229_s12, 1280  ;;  %s1040_s24 = smov [#allocation2]  }
  0x59   : > { %p902_p9 = scmp.ne.s32.totalorder %s1229_s12, %s901_s9  ;;  %s906_s13 = sshll.u32 %s1040_s24, 4  ;;  %s907_s13 = int_to_ptr.vmem [resolvable:$false] %s906_s13 }
  0x5a   : > { %s908_s7 = scalar_lea.vmem %s907_s13, 2560  ;;  %p909_p7 = scmp.lt.s32.totalorder %s1229_s12, %s907_s13 }
  0x5b   : > { %p904_p2 = pnand %p902_p9, %p888_p12  ;;  %p910_p4 = scmp.lt.s32.totalorder %s908_s7, %s901_s9 }
  0x5d   : > { %p905_p0 = pneg %p904_p2  ;;  %p911_p13 = por %p910_p4, %p909_p7 }
  0x5f   : > { %p912_p6 = pnand %p911_p13, %p905_p0 }
  0x61   : > { %915 = shalt.err (!%p912_p6)
}
  0x62   : > { %s1041_s28 = smov 256   ;;  %s1042_s8 = smov 16  }
  0x63   : > { %754 = dma.hbm_to_vmem [thread:$0]  (!%p1216_p11), %s1227_s29, 1280, %s1229_s12, %s1231_s14, %s1041_s28, %s1041_s28, %s1042_s8  }
  0x64   : > { %230 = sbr.rel (%p1130_p8) target bundleno = 516 (0x204), region = 32  ;;  %s1262_s6 = sand.u32 (!%p1130_p8), 1, %s1018_s16  }
  0x65   : > { %s729_s10 = smul.u32 (!%p1130_p8), 80, %s1262_s6  ;;  %s233_s11 = scalar_lea.sflag (!%p1130_p8), [#allocation3], %s1262_s6 }
  0x66   : > { %p1452_p7 = scmp.ne.s32.totalorder (!%p1130_p8), %s1446_s25, 0 }
  0x67   : > { %s1266_s9 = scalar_lea.vmem (!%p1130_p8), [#allocation2], %s729_s10 }
  0x6b   : > { %997 = dma.done.wait (%p1452_p7), %s233_s11, 1280  }
  0x6c   : > { %999 = vsyncadd (%p1452_p7), %s233_s11, 4294966016  ;;  %p1453_p11 = scmp.ne.s32.totalorder %s1444_s23, 0 }
  0x6e   : > { %1001 = dma.done.wait (%p1453_p11), [#allocation6], 1024  }
  0x6f   : > { %1003 = vsyncadd (%p1453_p11), [#allocation6], 4294966272  ;;  %v1043_v0 = vmov 0.0   ;;  %v1044_v1 = vmov 0   ;;  %v294_v2 = vld [vmem:[%s1266_s9 + $0x8] sm:$0xff]  ;;  %v296_v3 = vld [vmem:[%s1266_s9 + $0x18] sm:$0xff] }
  0x70   : > { %411 = vmatprep.mubr.f32.mxu0 %v1043_v0  ;;  %423 = vmatprep.mubr.f32.mxu1 %v1043_v0  ;;  %v293_v4 = vld [vmem:[%s1266_s9] sm:$0xff]  ;;  %v713_v5 = vpack.c.bf16 %v296_v3, %v294_v2  ;;  %v295_v6 = vld [vmem:[%s1266_s9 + $0x10] sm:$0xff]  ;;  %v298_v7 = vld [vmem:[%s1266_s9 + $0x28] sm:$0xff]  ;;  %vm340_vm0 = vcmask 1043456   ;;  %vm327_vm1 = vcmask 293888   ;;  %s687_s23 = sshll.u32 %s1262_s6, 6 }
  0x71   : > { %828 = vset.pattern.permute.xlu0 %v1044_v1  ;;  %829 = vset.pattern.permute.xlu1 %v1044_v1  ;;  %v300_v8 = vld [vmem:[%s1266_s9 + $0x38] sm:$0xff]  ;;  %v715_v9 = vpack.c.bf16 %v295_v6, %v293_v4  ;;  %v297_v11 = vld [vmem:[%s1266_s9 + $0x20] sm:$0xff]  ;;  %v299_v12 = vld [vmem:[%s1266_s9 + $0x30] sm:$0xff]  ;;  %vm280_vm2 = vcmask 7168   ;;  %s1291_s25 = scalar_lea.vmem [#allocation9], %s687_s23  ;;  %s1309_s27 = scalar_lea.vmem [#allocation8], %s687_s23 }
  0x72   : > { %v717_v10 = vpack.c.bf16 %v300_v8, %v298_v7  ;;  %714 = vmatprep.subr.bf16.mxu0 %v713_v5  ;;  %721 = vmatprep.subr.bf16.mxu1 %v713_v5  ;;  %v719_v13 = vpack.c.bf16 %v299_v12, %v297_v11  ;;  %v303_v14 = vld [vmem:[#allocation7] sm:$0xff]  ;;  %v305_v15 = vld [vmem:[#allocation7 + $0x10] sm:$0xff]  ;;  %v302_v16 = vld [vmem:[%s1266_s9 + $0x48] sm:$0xf]  ;;  %281 = vst.msk [vmem:[%s1291_s25] sm:$0xff] %vm280_vm2, %v1043_v0  ;;  %s523_s21 = sshll.u32 %s1309_s27, 4  ;;  %s1320_s21 = int_to_ptr.vmem [resolvable:$true] %s523_s21 }
  0x73   : > { %716 = vmatpush1.bf16.msra.mxu0 %v715_v9  ;;  %724 = vmatpush1.bf16.msra.mxu1 %v715_v9  ;;  %v304_v17 = vld [vmem:[#allocation7 + $0x8] sm:$0xff]  ;;  %v306_v18 = vld [vmem:[#allocation7 + $0x18] sm:$0xff]  ;;  %v301_v19 = vld [vmem:[%s1266_s9 + $0x40] sm:$0xf]  ;;  %282 = vst.msk [vmem:[%s1291_s25 + $0x8] sm:$0xff] %vm280_vm2, %v1043_v0  ;;  %s711_s12 = sshll.u32 %s1026_s18, 10 }
  0x74   : > { %718 = vmatprep.subr.bf16.mxu0 %v717_v10  ;;  %722 = vmatprep.subr.bf16.mxu1 %v717_v10  ;;  %v289_v20 = vld [vmem:[#allocation5] sm:$0xff]  ;;  %v291_v21 = vld [vmem:[#allocation5 + $0x10] sm:$0xff]  ;;  %v290_v22 = vld [vmem:[#allocation5 + $0x8] sm:$0xff]  ;;  %283 = vst.msk [vmem:[%s1291_s25 + $0x10] sm:$0xff] %vm280_vm2, %v1043_v0  ;;  %s1328_s24 = scalar_lea.hbm %s1438_s3, %s711_s12  ;;  %s503_s13 = scalar_lea.sflag [#allocation4], %s1262_s6 }
  0x75   : > { %309 = vperm.xlu0 %828, %v303_v14   ;;  %319 = vperm.xlu1 %829, %v305_v15   ;;  %v292_v23 = vld [vmem:[#allocation5 + $0x18] sm:$0xff]  ;;  %284 = vst.msk [vmem:[%s1291_s25 + $0x18] sm:$0xff] %vm280_vm2, %v1043_v0  ;;  %285 = vst.msk [vmem:[%s1291_s25 + $0x20] sm:$0xff] %vm280_vm2, %v1043_v0  ;;  %s916_s7 = scalar_lea.vmem %s1320_s21, 1024  ;;  %p1454_p12 = scmp.ne.s32.totalorder %s1450_s30, 0 }
  0x76   : > { %286 = vst.msk [vmem:[%s1291_s25 + $0x28] sm:$0xff] %vm280_vm2, %v1043_v0  ;;  %287 = vst.msk [vmem:[%s1291_s25 + $0x30] sm:$0xff] %vm280_vm2, %v1043_v0  ;;  %p917_p8 = scmp.ne.s32.totalorder %s1320_s21, %s916_s7  ;;  %s1045_s28 = smov [#allocation8]  }
  0x77   : > { %720 = vmatpush1.bf16.msra.mxu0 %v719_v13  ;;  %725 = vmatpush1.bf16.msra.mxu1 %v719_v13  ;;  %288 = vst.msk [vmem:[%s1291_s25 + $0x38] sm:$0xff] %vm280_vm2, %v1043_v0  ;;  %s920_s8 = sshll.u32 %s1045_s28, 4  ;;  %s921_s8 = int_to_ptr.vmem [resolvable:$false] %s920_s8 }
  0x78   : > { %689 = vmatprep.subr.msk.mxu0 %vm340_vm0, %v302_v16  ;;  %723 = vmatprep.subr.msk.mxu1 %vm340_vm0, %v302_v16  ;;  %p918_p1 = pnand %p917_p8, %p1454_p12  ;;  %s922_s10 = scalar_lea.vmem %s921_s8, 2048 }
  0x79   : > { %314 = vperm.xlu0 %828, %v304_v17   ;;  %324 = vperm.xlu1 %829, %v306_v18   ;;  %p923_p3 = scmp.lt.s32.totalorder %s1320_s21, %s921_s8  ;;  %p924_p5 = scmp.lt.s32.totalorder %s922_s10, %s916_s7 }
  0x7a   : > { %p919_p10 = pneg %p918_p1 }
  0x7b   : > { %690 = vmatpush1.msk.msra.mxu0 %vm340_vm0, %v301_v19  ;;  %726 = vmatpush1.msk.msra.mxu1 %vm340_vm0, %v301_v19  ;;  %p925_p9 = por %p924_p5, %p923_p3 }
  0x7c   : > { %691 = vmatmul.mubr.msk.f32.vlgmr.msra.gmra.mrb[0].mxu0 %vm327_vm1, %v289_v20  ;;  %693 = vmatmul.mubr.msk.f32.vlgmr.msra.gmra.mrb[0].mxu1 %vm327_vm1, %v291_v21 }
  0x7d   : > { %417 = vmatprep.mubr.f32.mxu0 %v1043_v0  ;;  %429 = vmatprep.mubr.f32.mxu1 %v1043_v0  ;;  %p926_p2 = pnand %p925_p9, %p919_p10 }
  0x80   : > { %692 = vmatmul.mubr.msk.f32.gmra.mrb[2].mxu0 %vm327_vm1, %v290_v22  ;;  %694 = vmatmul.mubr.msk.f32.gmra.mrb[2].mxu1 %vm327_vm1, %v292_v23 }
  0xf4   : > { %v320_v24 = vpop.permute.xlu1 %319  ;;  %v310_v25 = vpop.permute.xlu0 %309 }
  0xf8   : > { %v325_v34 = vpop.permute.xlu1 %324  ;;  %v315_v35 = vpop.permute.xlu0 %314 }
 0x14f   : > { %v413_v26 = vpop.f32.mrb[0].mxu0  ;;  %v425_v27 = vpop.f32.mrb[0].mxu1 }
 0x150   : > { %v414_v28 = vadd.f32 %v413_v26, %v310_v25  ;;  %v415_v29 = vpop.f32.mrb[1].mxu0  ;;  %v426_v30 = vadd.f32 %v425_v27, %v320_v24  ;;  %v427_v31 = vpop.f32.mrb[1].mxu1 }
 0x151   : > { %v416_v32 = vadd.f32 %v415_v29, %v310_v25  ;;  %v428_v33 = vadd.f32 %v427_v31, %v320_v24 }
 0x152   : > { %436 = vst [vmem:[%s1309_s27] sm:$0xff] %v414_v28  ;;  %440 = vst [vmem:[%s1309_s27 + $0x20] sm:$0xff] %v426_v30  ;;  %v474_v36 = vmul.f32 %v414_v28, %v414_v28  ;;  %v478_v37 = vmul.f32 %v426_v30, %v426_v30 }
 0x153   : > { %437 = vst [vmem:[%s1309_s27 + $0x8] sm:$0xff] %v416_v32  ;;  %441 = vst [vmem:[%s1309_s27 + $0x28] sm:$0xff] %v428_v33  ;;  %v419_v38 = vpop.f32.mrb[2].mxu0  ;;  %v431_v39 = vpop.f32.mrb[2].mxu1  ;;  %v448_v40 = vadd.f32 %v416_v32, %v414_v28  ;;  %v475_v41 = vmul.f32 %v416_v32, %v416_v32  ;;  %v454_v42 = vadd.f32 %v428_v33, %v426_v30 }
 0x154   : > { %v479_v43 = vmul.f32 %v428_v33, %v428_v33  ;;  %v420_v44 = vadd.f32 %v419_v38, %v315_v35  ;;  %v432_v45 = vadd.f32 %v431_v39, %v325_v34  ;;  %v421_v46 = vpop.f32.mrb[3].mxu0  ;;  %v433_v47 = vpop.f32.mrb[3].mxu1 }
 0x155   : > { %v422_v48 = vadd.f32 %v421_v46, %v315_v35  ;;  %v434_v49 = vadd.f32 %v433_v47, %v325_v34  ;;  %449 = vadd.xlane.f32.xlu0 %v448_v40  ;;  %v482_v50 = vadd.f32 %v475_v41, %v474_v36 }
 0x156   : > { %v488_v51 = vadd.f32 %v479_v43, %v478_v37  ;;  %438 = vst [vmem:[%s1309_s27 + $0x10] sm:$0xff] %v420_v44  ;;  %442 = vst [vmem:[%s1309_s27 + $0x30] sm:$0xff] %v432_v45  ;;  %v476_v52 = vmul.f32 %v420_v44, %v420_v44  ;;  %v480_v53 = vmul.f32 %v432_v45, %v432_v45 }
 0x157   : > { %439 = vst [vmem:[%s1309_s27 + $0x18] sm:$0xff] %v422_v48  ;;  %443 = vst [vmem:[%s1309_s27 + $0x38] sm:$0xff] %v434_v49  ;;  %483 = vadd.xlane.f32.xlu1 %v482_v50  ;;  %v451_v54 = vadd.f32 %v422_v48, %v420_v44  ;;  %v457_v55 = vadd.f32 %v434_v49, %v432_v45  ;;  %v477_v56 = vmul.f32 %v422_v48, %v422_v48 }
 0x158   : > { %v481_v57 = vmul.f32 %v434_v49, %v434_v49 }
 0x159   : > { %455 = vadd.xlane.f32.xlu0 %v454_v42  ;;  %v485_v58 = vadd.f32 %v477_v56, %v476_v52 }
 0x15a   : > { %v491_v59 = vadd.f32 %v481_v57, %v480_v53 }
 0x15b   : > { %452 = vadd.xlane.f32.xlu1 %v451_v54 }
 0x15d   : > { %458 = vadd.xlane.f32.xlu0 %v457_v55 }
 0x15f   : > { %489 = vadd.xlane.f32.xlu1 %v488_v51 }
 0x161   : > { %486 = vadd.xlane.f32.xlu0 %v485_v58 }
 0x165   : > { %492 = vadd.xlane.f32.xlu0 %v491_v59 }
 0x166   : > { %929 = shalt.err (!%p926_p2)
}
 0x167   : > { %s930_s11 = scalar_lea.hbm %s1328_s24, 1024  ;;  %s934_s27 = scalar_lea.hbm %s1438_s3, 2048 }
 0x168   : > { %p931_p0 = scmp.ne.s32.totalorder %s1328_s24, %s930_s11  ;;  %p935_p6 = scmp.lt.u32.totalorder %s1328_s24, %s1438_s3 }
 0x169   : > { %p936_p7 = scmp.lt.u32.totalorder %s934_s27, %s930_s11  ;;  %p938_p8 = scmp.lt.u32.totalorder %s930_s11, %s1328_s24 }
 0x16a   : > { %p932_p4 = pnand %p931_p0, %p1454_p12 }
 0x16b   : > { %p937_p11 = por %p936_p7, %p935_p6 }
 0x16c   : > { %p933_p13 = pneg %p932_p4 }
 0x16d   : > { %p939_p1 = por %p938_p8, %p937_p11 }
 0x16f   : > { %p940_p10 = pnand %p939_p1, %p933_p13 }
 0x171   : > { %943 = shalt.err (!%p940_p10)
}
 0x172   : > { %s1046_s7 = smov 256   ;;  %s1047_s28 = smov 16   ;;  %v444_v60 = vld [vmem:[%s1291_s25] sm:$0xff]  ;;  %v446_v1 = vld [vmem:[%s1291_s25 + $0x10] sm:$0xff]  ;;  %v445_v4 = vld [vmem:[%s1291_s25 + $0x8] sm:$0xff] }
 0x173   : > { %740 = dma.vmem_to_hbm [thread:$0]  (%p1454_p12), %s1320_s21, 1024, %s1328_s24, %s503_s13, %s1046_s7, %s1046_s7, %s1047_s28  }
 0x174   : > { %v695_v62 = vld [vmem:[%s1291_s25 + $0x20] sm:$0xff]  ;;  %v447_v7 = vld [vmem:[%s1291_s25 + $0x18] sm:$0xff]  ;;  %v697_v10 = vld [vmem:[%s1291_s25 + $0x30] sm:$0xff]  ;;  %s539_s21 = sshll.u32 %s1291_s25, 4  ;;  %s1382_s8 = scalar_lea.hbm %s1439_s4, %s711_s12  ;;  %s1384_s21 = int_to_ptr.vmem [resolvable:$true] %s539_s21 }
 0x175   : > { %v696_v13 = vld [vmem:[%s1291_s25 + $0x28] sm:$0xff]  ;;  %v698_v17 = vld [vmem:[%s1291_s25 + $0x38] sm:$0xff]  ;;  %s508_s10 = scalar_lea.sflag [#allocation10], %s1262_s6  ;;  %s944_s11 = scalar_lea.vmem %s1384_s21, 1024 }
 0x176   : > { %p945_p3 = scmp.ne.s32.totalorder %s1384_s21, %s944_s11  ;;  %s1048_s18 = smov [#allocation9]  }
 0x177   : > { %s948_s9 = sshll.u32 %s1048_s18, 4  ;;  %s949_s9 = int_to_ptr.vmem [resolvable:$false] %s948_s9 }
 0x178   : > { %p946_p5 = pnand %p945_p3, %p1454_p12  ;;  %s950_s23 = scalar_lea.vmem %s949_s9, 2048 }
 0x179   : > { %p951_p2 = scmp.lt.s32.totalorder %s1384_s21, %s949_s9  ;;  %p952_p0 = scmp.lt.s32.totalorder %s950_s23, %s944_s11 }
 0x17a   : > { %p947_p9 = pneg %p946_p5 }
 0x17b   : > { %p953_p4 = por %p952_p0, %p951_p2 }
 0x17d   : > { %p954_p13 = pnand %p953_p4, %p947_p9 }
 0x1e2   : > { %v450_v61 = vpop.xlane.xlu0 %449 }
 0x1e3   : > { %v460_v63 = vadd.f32 %v450_v61, %v444_v60 }
 0x1e4   : > { %v484_v0 = vpop.xlane.xlu1 %483 }
 0x1e5   : > { %465 = vst.msk [vmem:[%s1291_s25] sm:$0xff] %vm280_vm2, %v460_v63  ;;  %v494_v2 = vadd.f32 %v695_v62, %v484_v0 }
 0x1e6   : > { %v456_v3 = vpop.xlane.xlu0 %455 }
 0x1e7   : > { %699 = vst.msk [vmem:[%s1291_s25 + $0x20] sm:$0xff] %vm280_vm2, %v494_v2  ;;  %v462_v5 = vadd.f32 %v456_v3, %v446_v1 }
 0x1e8   : > { %v453_v6 = vpop.xlane.xlu1 %452 }
 0x1e9   : > { %467 = vst.msk [vmem:[%s1291_s25 + $0x10] sm:$0xff] %vm280_vm2, %v462_v5  ;;  %v461_v8 = vadd.f32 %v453_v6, %v445_v4 }
 0x1ea   : > { %v459_v9 = vpop.xlane.xlu0 %458 }
 0x1eb   : > { %466 = vst.msk [vmem:[%s1291_s25 + $0x8] sm:$0xff] %vm280_vm2, %v461_v8  ;;  %v463_v11 = vadd.f32 %v459_v9, %v447_v7 }
 0x1ec   : > { %v490_v12 = vpop.xlane.xlu1 %489 }
 0x1ed   : > { %468 = vst.msk [vmem:[%s1291_s25 + $0x18] sm:$0xff] %vm280_vm2, %v463_v11  ;;  %v496_v14 = vadd.f32 %v697_v10, %v490_v12 }
 0x1ee   : > { %v487_v15 = vpop.xlane.xlu0 %486 }
 0x1ef   : > { %701 = vst.msk [vmem:[%s1291_s25 + $0x30] sm:$0xff] %vm280_vm2, %v496_v14  ;;  %v495_v16 = vadd.f32 %v696_v13, %v487_v15 }
 0x1f1   : > { %700 = vst.msk [vmem:[%s1291_s25 + $0x28] sm:$0xff] %vm280_vm2, %v495_v16 }
 0x1f2   : > { %v493_v18 = vpop.xlane.xlu0 %492 }
 0x1f3   : > { %v497_v19 = vadd.f32 %v698_v17, %v493_v18 }
 0x1f5   : > { %702 = vst.msk [vmem:[%s1291_s25 + $0x38] sm:$0xff] %vm280_vm2, %v497_v19 }
 0x1f6   : > { %957 = shalt.err (!%p954_p13)
}
 0x1f7   : > { %s958_s25 = scalar_lea.hbm %s1382_s8, 1024  ;;  %s962_s29 = scalar_lea.hbm %s1439_s4, 2048 }
 0x1f8   : > { %p959_p6 = scmp.ne.s32.totalorder %s1382_s8, %s958_s25  ;;  %p963_p8 = scmp.lt.u32.totalorder %s1382_s8, %s1439_s4 }
 0x1f9   : > { %p964_p1 = scmp.lt.u32.totalorder %s962_s29, %s958_s25  ;;  %p966_p3 = scmp.lt.u32.totalorder %s958_s25, %s1382_s8 }
 0x1fa   : > { %p960_p7 = pnand %p959_p6, %p1454_p12 }
 0x1fb   : > { %p965_p10 = por %p964_p1, %p963_p8 }
 0x1fc   : > { %p961_p11 = pneg %p960_p7 }
 0x1fd   : > { %p967_p5 = por %p966_p3, %p965_p10 }
 0x1ff   : > { %p968_p9 = pnand %p967_p5, %p961_p11 }
 0x201   : > { %971 = shalt.err (!%p968_p9)
}
 0x202   : > { %s1049_s28 = smov 128   ;;  %s1050_s24 = smov 8  }
 0x203   : > { %741 = dma.vmem_to_hbm [thread:$0]  (%p1454_p12), %s1384_s21, 1024, %s1382_s8, %s508_s10, %s1049_s28, %s1049_s28, %s1050_s24  }
 0x204 PF: > { %s554_s13 = sand.u32 1, %s1014_s15   ;;  %p1455_p2 = scmp.ne.s32.totalorder %s1447_s26, 0 }
 0x205   : > { %p1456_p0 = scmp.ge.s32.totalorder %s1034_s20, 2  ;;  %s555_s11 = scalar_lea.sflag [#allocation4], %s554_s13 }
 0x207   : > { %p756_p4 = pnand %p1456_p0, %p1455_p2 }
 0x209   : > { %1005 = dma.done.wait (!%p756_p4), %s555_s11, 1024  }
 0x20a   : > { %1007 = vsyncadd (!%p756_p4), %s555_s11, 4294966272  ;;  %s564_s18 = scalar_lea.sflag [#allocation10], %s554_s13 }
 0x20b   : > { %1009 = dma.done.wait (!%p756_p4), %s564_s18, 1024  }
 0x20c   : > { %1011 = vsyncadd (!%p756_p4), %s564_s18, 4294966272  ;;  %s25_s20 = sadd.s32 1, %s1034_s20   ;;  %s1457_s15 = smov %s1018_s16 }
 0x20d   : > { %p22_p13 = scmp.ge.s32.totalorder %s25_s20, 4   ;;  %s1458_s16 = smov %s1022_s17 }
 0x20e   : > { %s1459_s17 = smov %s1221_s22  ;;  %s1460_s18 = smov %s1030_s19 }
 0x20f   : > { %s1461_s19 = smov %s1463_s5  ;;  %24 = sbr.rel (!%p22_p13) target bundleno = 9 (0x9), region = 107 }
 0x216   :  { %569 = vsyncpa [#allocation3], 1 }
 0x217   :  { %571 = vsyncpa [#allocation3 + $0x1], 1 }
 0x218   :  { %572 = vsyncpa [#allocation6], 1 }
 0x219   :  { %573 = vsyncpa [#allocation4], 1 }
 0x21a   :  { %575 = vsyncpa [#allocation4 + $0x1], 1 }
 0x21b   :  { %576 = vsyncpa [#allocation10], 1 }
 0x21c   :  { %578 = vsyncpa [#allocation10 + $0x1], 1 }

</bundles_post_ra>
